<compile_context>
chip_gen: v6e
topology: v6e:2x2x1
jax: 0.10.0
libtpu: 0.0.40
codegen_flags: <defaults>
</compile_context>

<pallas_src>
import jax
import jax.numpy as jnp
from jax import lax
from jax.experimental import pallas as pl
from jax.experimental.pallas import tpu as pltpu


def _round_up(x, m):
    return ((x + m - 1) // m) * m


def _pick_tile(dim, unit, cap):
    """Largest tile (multiple of `unit`, <= cap) that minimizes padding."""
    best_t, best_pad = unit, _round_up(dim, unit)
    t = unit
    while t <= cap:
        pad = _round_up(dim, t)
        if pad <= best_pad:          # prefer the larger tile when padding not worse
            best_t, best_pad = t, pad
        t += unit
    return best_t


# ---------------------------------------------------------------------------
# Kernel: y_tile = (inp_tile @ Vh^T) @ (U*S)^T_tile + bias_tile
#   inp_ref  : [tm, in_f]   bf16
#   vh_ref   : [rank, in_f] bf16   (resident across the whole grid)
#   ust_ref  : [rank, tn]   f32    ((U*S)^T, tiled over the out axis)
#   bias_ref : [1, tn]      f32
#   y_ref    : [tm, tn]     f32
# ---------------------------------------------------------------------------
def _svd_linear_kernel(inp_ref, vh_ref, ust_ref, bias_ref, y_ref):
    # t = inp @ Vh^T : contract in_features (NT form, no transpose emitted).
    t = lax.dot_general(
        inp_ref[...], vh_ref[...],
        dimension_numbers=(((1,), (1,)), ((), ())),
        preferred_element_type=jnp.float32)                  # [tm, rank] f32

    # y = t @ (U*S)^T : tiny rank-wide contraction, f32 for accuracy.
    y = jnp.dot(t, ust_ref[...],
                preferred_element_type=jnp.float32)          # [tm, tn] f32

    y_ref[...] = y + bias_ref[...]                           # epilogue on VPU


def svd_linear_forward(inp, weight, scale, bias, rank, *, tm_cap=512, tn_cap=512):
    batch, in_f = inp.shape
    out_f = weight.shape[0]

    # 1) Elementwise scaling: memory-bound, left to XLA.
    w_scaled = weight.astype(jnp.float32) * scale.astype(jnp.float32)[None, :]

    # 2) Low-rank factors in plain JAX.
    # TODO(synk): torch.svd_lowrank uses a randomized projection; the exact
    # truncated SVD computed here is the quantity it approximates.  SVD has no
    # clean Pallas equivalent and stays in XLA.
    U, S, Vh = jnp.linalg.svd(w_scaled, full_matrices=False)
    us_t = (U[:, :rank] * S[:rank][None, :]).T               # [rank, out] f32
    vh_r = Vh[:rank, :]                                      # [rank, in]

    # bf16 operands for the wide MXU contraction; small factors stay f32.
    inp_bf = inp.astype(jnp.bfloat16)
    vh_bf = vh_r.astype(jnp.bfloat16)
    ust_f32 = us_t.astype(jnp.float32)
    bias2d = (jnp.zeros((out_f,), jnp.float32) if bias is None
              else bias.astype(jnp.float32)).reshape(1, out_f)

    # 3) Tile plan: tm multiple of 16 (bf16 sublane packing), tn multiple of
    #    128 (lane-dense unmasked stores).  Minimize padding, cap for VMEM.
    tm = _pick_tile(batch, 16, tm_cap)
    tn = _pick_tile(out_f, 128, tn_cap)
    batch_pad = _round_up(batch, tm)
    out_pad = _round_up(out_f, tn)

    if batch_pad != batch:
        inp_bf = jnp.pad(inp_bf, ((0, batch_pad - batch), (0, 0)))
    if out_pad != out_f:
        ust_f32 = jnp.pad(ust_f32, ((0, 0), (0, out_pad - out_f)))
        bias2d = jnp.pad(bias2d, ((0, 0), (0, out_pad - out_f)))

    grid = (batch_pad // tm, out_pad // tn)

    grid_spec = pltpu.PrefetchScalarGridSpec(
        num_scalar_prefetch=0,
        grid=grid,
        in_specs=[
            pl.BlockSpec((tm, in_f), lambda i, j: (i, 0)),      # inp tile
            pl.BlockSpec((rank, in_f), lambda i, j: (0, 0)),    # Vh (resident)
            pl.BlockSpec((rank, tn), lambda i, j: (0, j)),      # (U*S)^T tile
            pl.BlockSpec((1, tn), lambda i, j: (0, j)),         # bias tile
        ],
        out_specs=pl.BlockSpec((tm, tn), lambda i, j: (i, j)),
    )

    y_pad = pl.pallas_call(
        _svd_linear_kernel,
        out_shape=jax.ShapeDtypeStruct((batch_pad, out_pad), jnp.float32),
        grid_spec=grid_spec,
        compiler_params=pltpu.CompilerParams(
            dimension_semantics=("parallel", "parallel"),
            vmem_limit_bytes=32 * 1024 * 1024,
        ),
    )(inp_bf, vh_bf, ust_f32, bias2d)

    return y_pad[:batch, :out_f]


if __name__ == "__main__":
    # Small deterministic shapes consistent with an nn.Linear(256 -> 384),
    # rank 8.  Chosen so the grid has multiple tiles.
    batch, in_f, out_f, rank = 384, 256, 384, 8

    key = jax.random.PRNGKey(0)
    k_w, k_s, k_b, k_x = jax.random.split(key, 4)
    weight = jax.random.normal(k_w, (out_f, in_f), dtype=jnp.float32) * 0.05
    scale = jax.random.uniform(k_s, (in_f,), dtype=jnp.float32,
                               minval=0.5, maxval=1.5)
    bias = jax.random.normal(k_b, (out_f,), dtype=jnp.float32) * 0.1
    inp = jax.random.normal(k_x, (batch, in_f), dtype=jnp.float32)

    y = svd_linear_forward(inp, weight, scale, bias, rank)
    jax.block_until_ready(y)

    # Reference: same math in full f32 (kernel uses bf16 operands on the wide
    # contraction with f32 accumulation, so compare with a loose tolerance).
    w_ref = weight * scale[None, :]
    U, S, Vh = jnp.linalg.svd(w_ref, full_matrices=False)
    new_w = (U[:, :rank] * S[:rank][None, :]) @ Vh[:rank, :]
    y_ref = inp @ new_w.T + bias[None, :]

    assert y.shape == y_ref.shape, "shape mismatch vs reference"
    assert jnp.allclose(y, y_ref, atol=5e-2, rtol=5e-2), "mismatch vs reference"

    print("KERNEL_OK")
</pallas_src>

<mosaic_0001>
module attributes {stable_mosaic.version = 11 : i64} {
  func.func @_svd_linear_kernel(%arg0: i32, %arg1: i32, %arg2: memref<384x256xbf16, #tpu.memory_space<vmem>>, %arg3: memref<8x256xbf16, #tpu.memory_space<vmem>>, %arg4: memref<8x384xf32, #tpu.memory_space<vmem>>, %arg5: memref<1x384xf32, #tpu.memory_space<vmem>>, %arg6: memref<384x384xf32, #tpu.memory_space<vmem>>) attributes {dimension_semantics = [#tpu.dimension_semantics<parallel>, #tpu.dimension_semantics<parallel>], iteration_bounds = array<i64: 1, 1>, scalar_prefetch = 0 : i64, scratch_operands = 0 : i64, tpu.core_type = #tpu.core_type<tc>, window_params = [{transform_indices = @transform_0, window_bounds = array<i64: 384, 256>}, {pipeline_mode = #tpu.pipeline_mode<synchronous>, transform_indices = @transform_1, window_bounds = array<i64: 8, 256>}, {transform_indices = @transform_2, window_bounds = array<i64: 8, 384>}, {transform_indices = @transform_3, window_bounds = array<i64: 1, 384>}, {transform_indices = @transform_4, window_bounds = array<i64: 384, 384>}]} {
    %c0 = arith.constant 0 : index
    %c0_0 = arith.constant 0 : index
    %0 = vector.load %arg2[%c0, %c0_0] : memref<384x256xbf16, #tpu.memory_space<vmem>>, vector<384x256xbf16>
    %c0_1 = arith.constant 0 : index
    %c0_2 = arith.constant 0 : index
    %1 = vector.load %arg3[%c0_1, %c0_2] : memref<8x256xbf16, #tpu.memory_space<vmem>>, vector<8x256xbf16>
    %cst = arith.constant dense<0.000000e+00> : vector<384x8xf32>
    %2 = tpu.matmul %0, %1, %cst {dimension_numbers = #tpu.dot_dimension_numbers<[1], [1], [0], [0], [0, 0, 1, 0], [], []>} : vector<384x256xbf16>, vector<8x256xbf16>, vector<384x8xf32> -> vector<384x8xf32>
    %c0_3 = arith.constant 0 : index
    %c0_4 = arith.constant 0 : index
    %3 = vector.load %arg4[%c0_3, %c0_4] : memref<8x384xf32, #tpu.memory_space<vmem>>, vector<8x384xf32>
    %cst_5 = arith.constant dense<0.000000e+00> : vector<384x384xf32>
    %4 = tpu.matmul %2, %3, %cst_5 {dimension_numbers = #tpu.dot_dimension_numbers<[1], [0], [0], [1], [0, 0, 1, 1], [], []>} : vector<384x8xf32>, vector<8x384xf32>, vector<384x384xf32> -> vector<384x384xf32>
    %c0_6 = arith.constant 0 : index
    %c0_7 = arith.constant 0 : index
    %5 = vector.load %arg5[%c0_6, %c0_7] : memref<1x384xf32, #tpu.memory_space<vmem>>, vector<1x384xf32>
    %6 = vector.broadcast %5 : vector<1x384xf32> to vector<384x384xf32>
    %7 = arith.addf %4, %6 : vector<384x384xf32>
    %c0_8 = arith.constant 0 : index
    %c0_9 = arith.constant 0 : index
    %8 = vector.load %arg6[%c0_8, %c0_9] : memref<384x384xf32, #tpu.memory_space<vmem>>, vector<384x384xf32>
    tpu.vector_store %arg6[%c0_8, %c0_9], %7 {strides = array<i32>} : memref<384x384xf32, #tpu.memory_space<vmem>>, vector<384x384xf32>,
    return
  }
  func.func @transform_0(%arg0: i32, %arg1: i32) -> (i32, i32) {
    %c0_i32 = arith.constant 0 : i32
    %c0_i32_0 = arith.constant 0 : i32
    return %arg0, %c0_i32 : i32, i32
  }
  func.func @transform_1(%arg0: i32, %arg1: i32) -> (i32, i32) {
    %c0_i32 = arith.constant 0 : i32
    %c0_i32_0 = arith.constant 0 : i32
    %c0_i32_1 = arith.constant 0 : i32
    return %c0_i32, %c0_i32_0 : i32, i32
  }
  func.func @transform_2(%arg0: i32, %arg1: i32) -> (i32, i32) {
    %c0_i32 = arith.constant 0 : i32
    %c0_i32_0 = arith.constant 0 : i32
    return %c0_i32, %arg1 : i32, i32
  }
  func.func @transform_3(%arg0: i32, %arg1: i32) -> (i32, i32) {
    %c0_i32 = arith.constant 0 : i32
    %c0_i32_0 = arith.constant 0 : i32
    return %c0_i32, %arg1 : i32, i32
  }
  func.func @transform_4(%arg0: i32, %arg1: i32) -> (i32, i32) {
    %c0_i32 = arith.constant 0 : i32
    return %arg0, %arg1 : i32, i32
  }
}

</mosaic_0001>

<bundles_post_ra>
// kernel: tpu_custom_call.1
= control target key start
LH: loop header
LB: loop body
LE: loop exit
PB: predicated region body
PF: predicated region fallthrough
CT: control target
= control target key end

     0   :  { %9 = vsyncpa [#allocation3], 0  ;;  %s2551_s0 = inlined_call_operand.hbm [shape: bf16[384,256], index: 0, kind: input, shape index: {}]   ;;  %s2552_s1 = inlined_call_operand.hbm [shape: bf16[8,256], index: 1, kind: input, shape index: {}]   ;;  %s2553_s2 = inlined_call_operand.hbm [shape: f32[8,384], index: 2, kind: input, shape index: {}]   ;;  %s2554_s3 = inlined_call_operand.vmem [shape: f32[1,384], index: 3, kind: input, shape index: {}]   ;;  %s2555_s4 = inlined_call_operand.hbm [shape: f32[384,384], index: 4, kind: output, shape index: {}]  }
   0x1   :  { %10 = vsyncpa [#allocation6], 0 }
   0x2   :  { %11 = vsyncpa [#allocation4], 0  ;;  %s2002_s15 = smov [#allocation5]   ;;  %s2003_s17 = smov [#allocation2]  }
   0x3   :  { %s30_s16 = sshll.u32 %s2002_s15, 4  ;;  %s17_s18 = sshll.u32 %s2003_s17, 4  ;;  %s31_s16 = int_to_ptr.vmem [resolvable:$true] %s30_s16  ;;  %s18_s18 = int_to_ptr.vmem [resolvable:$true] %s17_s18 }
   0x4   :  { %s1924_s19 = scalar_lea.vmem %s31_s16, 128  ;;  %p1929_p1 = scmp.lt.s32.totalorder %s31_s16, %s31_s16 }
   0x5   :  { %p1925_p0 = scmp.ne.s32.totalorder %s31_s16, %s1924_s19  ;;  %p1930_p2 = scmp.lt.s32.totalorder %s1924_s19, %s1924_s19 }
   0x7   :  { %p1931_p3 = por %p1930_p2, %p1929_p1 }
   0x9   :  { %p1932_p4 = pnand %p1931_p3, %p1925_p0 }
   0xb   :  { %1935 = shalt.err (!%p1932_p4)
}
   0xc   :  { %33 = dma.hbm_to_vmem [thread:$0]  %s2552_s1, 128, %s31_s16, [#allocation6]  }
   0xd   :  { %s1944_s22 = scalar_lea.vmem %s18_s18, 6144  ;;  %p1949_p6 = scmp.lt.s32.totalorder %s18_s18, %s18_s18 }
   0xe   :  { %p1945_p5 = scmp.ne.s32.totalorder %s18_s18, %s1944_s22  ;;  %p1950_p7 = scmp.lt.s32.totalorder %s1944_s22, %s1944_s22 }
  0x10   :  { %p1951_p8 = por %p1950_p7, %p1949_p6 }
  0x12   :  { %p1952_p9 = pnand %p1951_p8, %p1945_p5 }
  0x14   :  { %1955 = shalt.err (!%p1952_p9)
}
  0x15   :  { %s2004_s23 = smov 128   ;;  %s2005_s24 = smov 8  }
  0x16   :  { %23 = dma.hbm_to_vmem [thread:$0]  %s2551_s0, 6144, %s18_s18, [#allocation3], %s2004_s23, %s2004_s23, %s2005_s24  }
  0x17   :  { %s2006_s27 = smov [#allocation7]  }
  0x18   :  { %s40_s28 = sshll.u32 %s2006_s27, 4  ;;  %s41_s28 = int_to_ptr.vmem [resolvable:$true] %s40_s28 }
  0x19   :  { %s1964_s29 = scalar_lea.vmem %s41_s28, 384  ;;  %p1969_p11 = scmp.lt.s32.totalorder %s41_s28, %s41_s28 }
  0x1a   :  { %p1965_p10 = scmp.ne.s32.totalorder %s41_s28, %s1964_s29  ;;  %p1970_p12 = scmp.lt.s32.totalorder %s1964_s29, %s1964_s29 }
  0x1c   :  { %p1971_p13 = por %p1970_p12, %p1969_p11 }
  0x1e   :  { %p1972_p0 = pnand %p1971_p13, %p1965_p10 }
  0x20   :  { %1975 = shalt.err (!%p1972_p0)
}
  0x21   :  { %43 = dma.hbm_to_vmem [thread:$0]  %s2553_s2, 384, %s41_s28, [#allocation6]  }
  0x22   :  { %1996 = dma.done.wait [#allocation3], 6144  }
  0x23   :  { %1997 = vsyncadd [#allocation3], 4294961152 }
  0x24   :  { %1998 = dma.done.wait [#allocation6], 512  }
  0x25   :  { %1999 = vsyncadd [#allocation6], 4294966784  ;;  %v104_v0 = vld [vmem:[#allocation5] sm:$0xff]  ;;  %v1847_v5 = vld [vmem:[#allocation2 + $0x14] ss:$8 sps:$4 sm:$0xff]   ;;  %v2007_v24 = vmov 0.0  }
  0x26   :  { %v1611_v1 = vcombine.high %v104_v0, %v104_v0  ;;  %v1610_v2 = vcombine.low %v104_v0, %v104_v0  ;;  %v1846_v3 = vld [vmem:[#allocation2 + $0x4] ss:$8 sps:$4 sm:$0xff]   ;;  %v1844_v4 = vld [vmem:[#allocation2] ss:$8 sps:$4 sm:$0xff]   ;;  %v1849_v6 = vld [vmem:[#allocation2 + $0x10] ss:$8 sps:$4 sm:$0xff]   ;;  %872 = vmatprep.mubr.f32.mxu1 %v2007_v24 }
  0x27   :  { %384 = vmatprep.mubr.bf16.mxu0 %v1846_v3  ;;  %v1850_v7 = vld [vmem:[#allocation2 + $0x24] ss:$8 sps:$4 sm:$0xff]   ;;  %v1852_v8 = vld [vmem:[#allocation2 + $0x20] ss:$8 sps:$4 sm:$0xff]   ;;  %v1853_v9 = vld [vmem:[#allocation2 + $0x34] ss:$8 sps:$4 sm:$0xff]  }
  0x28   :  { %366 = vmatprep.subr.bf16.mxu0 %v1611_v1  ;;  %v1855_v10 = vld [vmem:[#allocation2 + $0x30] ss:$8 sps:$4 sm:$0xff]   ;;  %v1856_v11 = vld [vmem:[#allocation2 + $0x44] ss:$8 sps:$4 sm:$0xff]   ;;  %v1858_v12 = vld [vmem:[#allocation2 + $0x40] ss:$8 sps:$4 sm:$0xff]  }
  0x29   :  { %367 = vmatpush1.bf16.xpose.msra.mxu0 %v1610_v2  ;;  %v1859_v13 = vld [vmem:[#allocation2 + $0x54] ss:$8 sps:$4 sm:$0xff]   ;;  %v1861_v14 = vld [vmem:[#allocation2 + $0x50] ss:$8 sps:$4 sm:$0xff]   ;;  %v1862_v15 = vld [vmem:[#allocation2 + $0x64] ss:$8 sps:$4 sm:$0xff]  }
  0x2a   :  { %v1864_v16 = vld [vmem:[#allocation2 + $0x60] ss:$8 sps:$4 sm:$0xff]   ;;  %v1865_v17 = vld [vmem:[#allocation2 + $0x74] ss:$8 sps:$4 sm:$0xff]   ;;  %v1867_v18 = vld [vmem:[#allocation2 + $0x70] ss:$8 sps:$4 sm:$0xff]  }
  0x2b   :  { %v1868_v19 = vld [vmem:[#allocation2 + $0x84] ss:$8 sps:$4 sm:$0xff]   ;;  %v578_v20 = vld [vmem:[#allocation7 + $0x8] sm:$0xff]  ;;  %v1870_v21 = vld [vmem:[#allocation2 + $0x80] ss:$8 sps:$4 sm:$0xff]   ;;  %vm597_vm0 = vcmask 64512  }
  0x2c   :  { %772 = vmatprep.subr.mxu0 %v578_v20  ;;  %1831 = vmatprep.subr.mxu1 %v578_v20  ;;  %v1871_v22 = vld [vmem:[#allocation2 + $0x94] ss:$8 sps:$4 sm:$0xff]   ;;  %v577_v23 = vld [vmem:[#allocation7] sm:$0xff]  ;;  %v1873_v25 = vld [vmem:[#allocation2 + $0x90] ss:$8 sps:$4 sm:$0xff]  }
  0x2d   :  { %1832 = vmatpush1.msra.mxu1 %v577_v23  ;;  %v1874_v26 = vld [vmem:[#allocation2 + $0xa4] ss:$8 sps:$4 sm:$0xff]   ;;  %v1876_v27 = vld [vmem:[#allocation2 + $0xa0] ss:$8 sps:$4 sm:$0xff]   ;;  %v1877_v28 = vld [vmem:[#allocation2 + $0xb4] ss:$8 sps:$4 sm:$0xff]  }
  0x2e   :  { %v1879_v29 = vld [vmem:[#allocation2 + $0xb0] ss:$8 sps:$4 sm:$0xff]   ;;  %v1880_v30 = vld [vmem:[#allocation2 + $0xc4] ss:$8 sps:$4 sm:$0xff]   ;;  %v1882_v31 = vld [vmem:[#allocation2 + $0xc0] ss:$8 sps:$4 sm:$0xff]  }
  0x2f   :  { %v1883_v32 = vld [vmem:[#allocation2 + $0xd4] ss:$8 sps:$4 sm:$0xff]   ;;  %v1885_v33 = vld [vmem:[#allocation2 + $0xd0] ss:$8 sps:$4 sm:$0xff]   ;;  %v1886_v34 = vld [vmem:[#allocation2 + $0xe4] ss:$8 sps:$4 sm:$0xff]  }
  0x30   :  { %385 = vmatmul.mubr.bf16.vlgmr.msra.gmra.mxu0 %v1844_v4  ;;  %v1888_v35 = vld [vmem:[#allocation2 + $0xe0] ss:$8 sps:$4 sm:$0xff]   ;;  %v2046_v36 = vld [vmem:[#allocation7 + $0x10] sm:$0xff]  ;;  %v1892_v39 = vld [vmem:[#allocation2 + $0x104] ss:$8 sps:$4 sm:$0xff]  }
  0x31   :  { %392 = vmatprep.mubr.bf16.mxu0 %v1847_v5  ;;  %773 = vmatpush1.msra.mxu0 %v577_v23  ;;  %v1889_v37 = vld [vmem:[#allocation2 + $0xf4] ss:$8 sps:$4 sm:$0xff]   ;;  %v1891_v38 = vld [vmem:[#allocation2 + $0xf0] ss:$8 sps:$4 sm:$0xff]   ;;  %v1894_v40 = vld [vmem:[#allocation2 + $0x100] ss:$8 sps:$4 sm:$0xff]  }
  0x32   :  { %1757 = vmatprep.subr.mxu1 %v2046_v36  ;;  %v1895_v41 = vld [vmem:[#allocation2 + $0x114] ss:$8 sps:$4 sm:$0xff]   ;;  %v1897_v42 = vld [vmem:[#allocation2 + $0x110] ss:$8 sps:$4 sm:$0xff]   ;;  %v1898_v43 = vld [vmem:[#allocation2 + $0x124] ss:$8 sps:$4 sm:$0xff]  }
  0x33   :  { %v1900_v44 = vld [vmem:[#allocation2 + $0x120] ss:$8 sps:$4 sm:$0xff]   ;;  %v1901_v45 = vld [vmem:[#allocation2 + $0x134] ss:$8 sps:$4 sm:$0xff]   ;;  %v1903_v46 = vld [vmem:[#allocation2 + $0x130] ss:$8 sps:$4 sm:$0xff]  }
  0x34   :  { %v1904_v47 = vld [vmem:[#allocation2 + $0x144] ss:$8 sps:$4 sm:$0xff]   ;;  %v1906_v48 = vld [vmem:[#allocation2 + $0x140] ss:$8 sps:$4 sm:$0xff]   ;;  %v1907_v49 = vld [vmem:[#allocation2 + $0x154] ss:$8 sps:$4 sm:$0xff]  }
  0x35   :  { %v1909_v50 = vld [vmem:[#allocation2 + $0x150] ss:$8 sps:$4 sm:$0xff]   ;;  %v1910_v51 = vld [vmem:[#allocation2 + $0x164] ss:$8 sps:$4 sm:$0xff]   ;;  %v1912_v52 = vld [vmem:[#allocation2 + $0x160] ss:$8 sps:$4 sm:$0xff]  }
  0x36   :  { %v1913_v53 = vld [vmem:[#allocation2 + $0x174] ss:$8 sps:$4 sm:$0xff]   ;;  %v1915_v54 = vld [vmem:[#allocation2 + $0x170] ss:$8 sps:$4 sm:$0xff]  }
  0x38   :  { %393 = vmatmul.mubr.bf16.gmra.mxu0 %v1849_v6 }
  0x39   :  { %400 = vmatprep.mubr.bf16.mxu0 %v1850_v7 }
  0x40   :  { %401 = vmatmul.mubr.bf16.gmra.mxu0 %v1852_v8 }
  0x41   :  { %408 = vmatprep.mubr.bf16.mxu0 %v1853_v9 }
  0x48   :  { %409 = vmatmul.mubr.bf16.gmra.mxu0 %v1855_v10 }
  0x49   :  { %416 = vmatprep.mubr.bf16.mxu0 %v1856_v11 }
  0x50   :  { %417 = vmatmul.mubr.bf16.gmra.mxu0 %v1858_v12 }
  0x51   :  { %424 = vmatprep.mubr.bf16.mxu0 %v1859_v13 }
  0x58   :  { %425 = vmatmul.mubr.bf16.gmra.mxu0 %v1861_v14 }
  0x59   :  { %432 = vmatprep.mubr.bf16.mxu0 %v1862_v15 }
  0x60   :  { %433 = vmatmul.mubr.bf16.gmra.mxu0 %v1864_v16 }
  0x61   :  { %440 = vmatprep.mubr.bf16.mxu0 %v1865_v17 }
  0x68   :  { %441 = vmatmul.mubr.bf16.gmra.mxu0 %v1867_v18 }
  0x69   :  { %448 = vmatprep.mubr.bf16.mxu0 %v1868_v19 }
  0x70   :  { %449 = vmatmul.mubr.bf16.gmra.mxu0 %v1870_v21 }
  0x71   :  { %456 = vmatprep.mubr.bf16.mxu0 %v1871_v22 }
  0x78   :  { %457 = vmatmul.mubr.bf16.gmra.mxu0 %v1873_v25 }
  0x79   :  { %464 = vmatprep.mubr.bf16.mxu0 %v1874_v26 }
  0x80   :  { %465 = vmatmul.mubr.bf16.gmra.mxu0 %v1876_v27 }
  0x81   :  { %472 = vmatprep.mubr.bf16.mxu0 %v1877_v28 }
  0x88   :  { %473 = vmatmul.mubr.bf16.gmra.mxu0 %v1879_v29 }
  0x89   :  { %480 = vmatprep.mubr.bf16.mxu0 %v1880_v30 }
  0x90   :  { %481 = vmatmul.mubr.bf16.gmra.mxu0 %v1882_v31 }
  0x91   :  { %488 = vmatprep.mubr.bf16.mxu0 %v1883_v32 }
  0x98   :  { %489 = vmatmul.mubr.bf16.gmra.mxu0 %v1885_v33 }
  0x99   :  { %496 = vmatprep.mubr.bf16.mxu0 %v1886_v34 }
  0xa0   :  { %497 = vmatmul.mubr.bf16.gmra.mxu0 %v1888_v35 }
  0xa1   :  { %504 = vmatprep.mubr.bf16.mxu0 %v1889_v37 }
  0xa8   :  { %505 = vmatmul.mubr.bf16.gmra.mxu0 %v1891_v38 }
  0xa9   :  { %512 = vmatprep.mubr.bf16.mxu0 %v1892_v39 }
  0xb0   :  { %513 = vmatmul.mubr.bf16.gmra.mxu0 %v1894_v40 }
  0xb1   :  { %520 = vmatprep.mubr.bf16.mxu0 %v1895_v41 }
  0xb8   :  { %521 = vmatmul.mubr.bf16.gmra.mxu0 %v1897_v42 }
  0xb9   :  { %528 = vmatprep.mubr.bf16.mxu0 %v1898_v43 }
  0xc0   :  { %529 = vmatmul.mubr.bf16.gmra.mxu0 %v1900_v44 }
  0xc1   :  { %536 = vmatprep.mubr.bf16.mxu0 %v1901_v45 }
  0xc8   :  { %537 = vmatmul.mubr.bf16.gmra.mxu0 %v1903_v46 }
  0xc9   :  { %544 = vmatprep.mubr.bf16.mxu0 %v1904_v47 }
  0xd0   :  { %545 = vmatmul.mubr.bf16.gmra.mxu0 %v1906_v48 }
  0xd1   :  { %552 = vmatprep.mubr.bf16.mxu0 %v1907_v49 }
  0xd8   :  { %553 = vmatmul.mubr.bf16.gmra.mxu0 %v1909_v50 }
  0xd9   :  { %560 = vmatprep.mubr.bf16.mxu0 %v1910_v51 }
  0xe0   :  { %561 = vmatmul.mubr.bf16.gmra.mxu0 %v1912_v52 }
  0xe1   :  { %568 = vmatprep.mubr.bf16.mxu0 %v1913_v53 }
  0xe8   :  { %569 = vmatmul.mubr.bf16.gmra.mxu0 %v1915_v54 }
  0xe9   :  { %806 = vmatprep.mubr.f32.mxu0 %v2007_v24 }
  0xf0   :  { %v2050_v55 = vpop.f32.mrf.mxu0 }
  0xf1   :  { %1612 = vmatmul.mubr.msk.f32.vlgmr.msra.gmra.mxu0 %vm597_vm0, %v2050_v55 }
  0xf2   :  { %v388_v56 = vpop.f32.mrf.mxu0  ;;  %812 = vmatprep.mubr.f32.mxu0 %v2007_v24 }
  0xf4   :  { %v2055_v57 = vpop.f32.mrf.mxu0 }
  0xf5   :  { %1613 = vmatmul.mubr.msk.f32.gmra.mxu0 %vm597_vm0, %v2055_v57 }
  0xf6   :  { %v391_v58 = vpop.f32.mrf.mxu0  ;;  %818 = vmatprep.mubr.f32.mxu0 %v2007_v24 }
  0xf8   :  { %v2060_v59 = vpop.f32.mrf.mxu0 }
  0xf9   :  { %1614 = vmatmul.mubr.msk.f32.gmra.mxu0 %vm597_vm0, %v2060_v59 }
  0xfa   :  { %v396_v60 = vpop.f32.mrf.mxu0  ;;  %824 = vmatprep.mubr.f32.mxu0 %v2007_v24 }
  0xfc   :  { %v2065_v61 = vpop.f32.mrf.mxu0 }
  0xfd   :  { %1615 = vmatmul.mubr.msk.f32.gmra.mxu0 %vm597_vm0, %v2065_v61 }
  0xfe   :  { %v399_v62 = vpop.f32.mrf.mxu0  ;;  %830 = vmatprep.mubr.f32.mxu0 %v2007_v24 }
 0x100   :  { %v2070_v63 = vpop.f32.mrf.mxu0 }
 0x101   :  { %1616 = vmatmul.mubr.msk.f32.gmra.mxu0 %vm597_vm0, %v2070_v63 }
 0x102   :  { %v404_v0 = vpop.f32.mrf.mxu0  ;;  %836 = vmatprep.mubr.f32.mxu0 %v2007_v24 }
 0x104   :  { %v2075_v1 = vpop.f32.mrf.mxu0 }
 0x105   :  { %1617 = vmatmul.mubr.msk.f32.gmra.mxu0 %vm597_vm0, %v2075_v1 }
 0x106   :  { %v407_v2 = vpop.f32.mrf.mxu0  ;;  %842 = vmatprep.mubr.f32.mxu0 %v2007_v24 }
 0x108   :  { %v2080_v3 = vpop.f32.mrf.mxu0 }
 0x109   :  { %1618 = vmatmul.mubr.msk.f32.gmra.mxu0 %vm597_vm0, %v2080_v3 }
 0x10a   :  { %v412_v4 = vpop.f32.mrf.mxu0  ;;  %848 = vmatprep.mubr.f32.mxu0 %v2007_v24 }
 0x10c   :  { %v2085_v5 = vpop.f32.mrf.mxu0 }
 0x10d   :  { %1619 = vmatmul.mubr.msk.f32.gmra.mxu0 %vm597_vm0, %v2085_v5 }
 0x10e   :  { %v415_v6 = vpop.f32.mrf.mxu0  ;;  %854 = vmatprep.mubr.f32.mxu0 %v2007_v24 }
 0x110   :  { %v2090_v7 = vpop.f32.mrf.mxu0 }
 0x111   :  { %1620 = vmatmul.mubr.msk.f32.gmra.mxu0 %vm597_vm0, %v2090_v7 }
 0x112   :  { %v420_v8 = vpop.f32.mrf.mxu0  ;;  %860 = vmatprep.mubr.f32.mxu0 %v2007_v24 }
 0x114   :  { %v2095_v9 = vpop.f32.mrf.mxu0 }
 0x115   :  { %1621 = vmatmul.mubr.msk.f32.gmra.mxu0 %vm597_vm0, %v2095_v9 }
 0x116   :  { %v423_v10 = vpop.f32.mrf.mxu0  ;;  %866 = vmatprep.mubr.f32.mxu0 %v2007_v24 }
 0x118   :  { %v2100_v11 = vpop.f32.mrf.mxu0 }
 0x119   :  { %1622 = vmatmul.mubr.msk.f32.gmra.mxu0 %vm597_vm0, %v2100_v11 }
 0x11a   :  { %v428_v12 = vpop.f32.mrf.mxu0 }
 0x11c   :  { %v2104_v13 = vpop.f32.mrf.mxu0 }
 0x11d   :  { %1623 = vmatmul.mubr.msk.f32.vlgmr.msra.gmra.mxu1 %vm597_vm0, %v2104_v13 }
 0x11e   :  { %1758 = vmatpush3.msra.mxu1 %v2046_v36  ;;  %v431_v14 = vpop.f32.mrf.mxu0  ;;  %878 = vmatprep.mubr.f32.mxu1 %v2007_v24 }
 0x120   :  { %v2110_v15 = vpop.f32.mrf.mxu0 }
 0x121   :  { %1624 = vmatmul.mubr.msk.f32.gmra.mxu1 %vm597_vm0, %v2110_v15 }
 0x122   :  { %v436_v16 = vpop.f32.mrf.mxu0  ;;  %884 = vmatprep.mubr.f32.mxu1 %v2007_v24 }
 0x124   :  { %v2115_v17 = vpop.f32.mrf.mxu0 }
 0x125   :  { %1625 = vmatmul.mubr.msk.f32.gmra.mxu1 %vm597_vm0, %v2115_v17 }
 0x126   :  { %v439_v18 = vpop.f32.mrf.mxu0  ;;  %890 = vmatprep.mubr.f32.mxu1 %v2007_v24 }
 0x128   :  { %v2120_v19 = vpop.f32.mrf.mxu0 }
 0x129   :  { %1626 = vmatmul.mubr.msk.f32.gmra.mxu1 %vm597_vm0, %v2120_v19 }
 0x12a   :  { %v444_v20 = vpop.f32.mrf.mxu0  ;;  %896 = vmatprep.mubr.f32.mxu1 %v2007_v24 }
 0x12c   :  { %v2125_v21 = vpop.f32.mrf.mxu0 }
 0x12d   :  { %1627 = vmatmul.mubr.msk.f32.gmra.mxu1 %vm597_vm0, %v2125_v21 }
 0x12e   :  { %v447_v22 = vpop.f32.mrf.mxu0  ;;  %902 = vmatprep.mubr.f32.mxu1 %v2007_v24 }
 0x130   :  { %v2130_v23 = vpop.f32.mrf.mxu0 }
 0x131   :  { %1628 = vmatmul.mubr.msk.f32.gmra.mxu1 %vm597_vm0, %v2130_v23 }
 0x132   :  { %v452_v25 = vpop.f32.mrf.mxu0  ;;  %908 = vmatprep.mubr.f32.mxu1 %v2007_v24 }
 0x134   :  { %v2135_v26 = vpop.f32.mrf.mxu0 }
 0x135   :  { %1629 = vmatmul.mubr.msk.f32.gmra.mxu1 %vm597_vm0, %v2135_v26 }
 0x136   :  { %v455_v27 = vpop.f32.mrf.mxu0  ;;  %914 = vmatprep.mubr.f32.mxu1 %v2007_v24 }
 0x138   :  { %v2140_v28 = vpop.f32.mrf.mxu0 }
 0x139   :  { %1630 = vmatmul.mubr.msk.f32.gmra.mxu1 %vm597_vm0, %v2140_v28 }
 0x13a   :  { %v460_v29 = vpop.f32.mrf.mxu0  ;;  %920 = vmatprep.mubr.f32.mxu1 %v2007_v24 }
 0x13c   :  { %v2145_v30 = vpop.f32.mrf.mxu0 }
 0x13d   :  { %1631 = vmatmul.mubr.msk.f32.gmra.mxu1 %vm597_vm0, %v2145_v30 }
 0x13e   :  { %v463_v31 = vpop.f32.mrf.mxu0  ;;  %926 = vmatprep.mubr.f32.mxu1 %v2007_v24 }
 0x140   :  { %v2150_v32 = vpop.f32.mrf.mxu0 }
 0x141   :  { %1632 = vmatmul.mubr.msk.f32.gmra.mxu1 %vm597_vm0, %v2150_v32 }
 0x142   :  { %v468_v33 = vpop.f32.mrf.mxu0  ;;  %932 = vmatprep.mubr.f32.mxu1 %v2007_v24 }
 0x144   :  { %v2155_v34 = vpop.f32.mrf.mxu0 }
 0x145   :  { %1633 = vmatmul.mubr.msk.f32.gmra.mxu1 %vm597_vm0, %v2155_v34 }
 0x146   :  { %v471_v35 = vpop.f32.mrf.mxu0  ;;  %938 = vmatprep.mubr.f32.mxu1 %v2007_v24 }
 0x148   :  { %v2160_v36 = vpop.f32.mrf.mxu0 }
 0x149   :  { %1634 = vmatmul.mubr.msk.f32.gmra.mxu1 %vm597_vm0, %v2160_v36 }
 0x14a   :  { %v476_v37 = vpop.f32.mrf.mxu0  ;;  %944 = vmatprep.mubr.f32.mxu1 %v2007_v24 }
 0x14c   :  { %v2165_v38 = vpop.f32.mrf.mxu0 }
 0x14d   :  { %1635 = vmatmul.mubr.msk.f32.gmra.mxu1 %vm597_vm0, %v2165_v38 }
 0x14e   :  { %v479_v39 = vpop.f32.mrf.mxu0  ;;  %950 = vmatprep.mubr.f32.mxu1 %v2007_v24 }
 0x150   :  { %v2170_v40 = vpop.f32.mrf.mxu0 }
 0x151   :  { %1636 = vmatmul.mubr.msk.f32.gmra.mxu1 %vm597_vm0, %v2170_v40 }
 0x152   :  { %v484_v41 = vpop.f32.mrf.mxu0  ;;  %956 = vmatprep.mubr.f32.mxu1 %v2007_v24 }
 0x154   :  { %v2175_v42 = vpop.f32.mrf.mxu0 }
 0x155   :  { %1637 = vmatmul.mubr.msk.f32.gmra.mxu1 %vm597_vm0, %v2175_v42 }
 0x156   :  { %v487_v43 = vpop.f32.mrf.mxu0  ;;  %962 = vmatprep.mubr.f32.mxu1 %v2007_v24 }
 0x158   :  { %v2180_v44 = vpop.f32.mrf.mxu0 }
 0x159   :  { %1638 = vmatmul.mubr.msk.f32.gmra.mxu1 %vm597_vm0, %v2180_v44 }
 0x15a   :  { %v492_v45 = vpop.f32.mrf.mxu0  ;;  %968 = vmatprep.mubr.f32.mxu1 %v2007_v24 }
 0x15c   :  { %v2185_v46 = vpop.f32.mrf.mxu0 }
 0x15d   :  { %1639 = vmatmul.mubr.msk.f32.gmra.mxu1 %vm597_vm0, %v2185_v46 }
 0x15e   :  { %v495_v47 = vpop.f32.mrf.mxu0  ;;  %974 = vmatprep.mubr.f32.mxu1 %v2007_v24 }
 0x15f   :  { %v582_v47 = vlaneseq }
 0x160   :  { %v2190_v48 = vpop.f32.mrf.mxu0 }
 0x161   :  { %1640 = vmatmul.mubr.msk.f32.gmra.mxu1 %vm597_vm0, %v2190_v48 }
 0x162   :  { %v500_v49 = vpop.f32.mrf.mxu0  ;;  %980 = vmatprep.mubr.f32.mxu1 %v2007_v24 }
 0x164   :  { %v2195_v50 = vpop.f32.mrf.mxu0 }
 0x165   :  { %1641 = vmatmul.mubr.msk.f32.gmra.mxu1 %vm597_vm0, %v2195_v50 }
 0x166   :  { %v503_v51 = vpop.f32.mrf.mxu0  ;;  %986 = vmatprep.mubr.f32.mxu1 %v2007_v24 }
 0x168   :  { %v2200_v52 = vpop.f32.mrf.mxu0 }
 0x169   :  { %1642 = vmatmul.mubr.msk.f32.gmra.mxu1 %vm597_vm0, %v2200_v52 }
 0x16a   :  { %v508_v53 = vpop.f32.mrf.mxu0  ;;  %992 = vmatprep.mubr.f32.mxu1 %v2007_v24 }
 0x16b   :  { %v2280_v53 = vshrl.u32 %v582_v47, 7 }
 0x16c   :  { %v2205_v54 = vpop.f32.mrf.mxu0 }
 0x16d   :  { %1643 = vmatmul.mubr.msk.f32.gmra.mxu1 %vm597_vm0, %v2205_v54 }
 0x16e   :  { %v511_v56 = vpop.f32.mrf.mxu0  ;;  %998 = vmatprep.mubr.f32.mxu1 %v2007_v24 }
 0x170   :  { %v2210_v58 = vpop.f32.mrf.mxu0 }
 0x171   :  { %1644 = vmatmul.mubr.msk.f32.gmra.mxu1 %vm597_vm0, %v2210_v58 }
 0x172   :  { %v516_v60 = vpop.f32.mrf.mxu0  ;;  %1004 = vmatprep.mubr.f32.mxu1 %v2007_v24 }
 0x174   :  { %v2215_v62 = vpop.f32.mrf.mxu0 }
 0x175   :  { %1645 = vmatmul.mubr.msk.f32.gmra.mxu1 %vm597_vm0, %v2215_v62 }
 0x176   :  { %v519_v0 = vpop.f32.mrf.mxu0  ;;  %1010 = vmatprep.mubr.f32.mxu1 %v2007_v24 }
 0x177   :  { %v584_v0 = vsub.s32 0, %v2280_v53 }
 0x178   :  { %v2220_v2 = vpop.f32.mrf.mxu0 }
 0x179   :  { %1646 = vmatmul.mubr.msk.f32.gmra.mxu1 %vm597_vm0, %v2220_v2 }
 0x17a   :  { %v524_v4 = vpop.f32.mrf.mxu0  ;;  %1016 = vmatprep.mubr.f32.mxu1 %v2007_v24 }
 0x17b   :  { %v2291_v4 = vld [vmem:[%s2554_s3] sm:$0x7]  ;;  %s2008_s3 = smov [#allocation8]  }
 0x17c   :  { %v2225_v6 = vpop.f32.mrf.mxu0  ;;  %s1549_s5 = sshll.u32 %s2008_s3, 4  ;;  %s1550_s5 = int_to_ptr.vmem [resolvable:$true] %s1549_s5 }
 0x17d   :  { %1647 = vmatmul.mubr.msk.f32.gmra.mxu1 %vm597_vm0, %v2225_v6  ;;  %s1976_s6 = scalar_lea.vmem %s1550_s5, 18432  ;;  %p1981_p2 = scmp.lt.s32.totalorder %s1550_s5, %s1550_s5 }
 0x17e   :  { %v527_v8 = vpop.f32.mrf.mxu0  ;;  %1022 = vmatprep.mubr.f32.mxu1 %v2007_v24  ;;  %p1977_p1 = scmp.ne.s32.totalorder %s1550_s5, %s1976_s6  ;;  %p1982_p3 = scmp.lt.s32.totalorder %s1976_s6, %s1976_s6 }
 0x180   :  { %v2230_v10 = vpop.f32.mrf.mxu0  ;;  %p1983_p4 = por %p1982_p3, %p1981_p2 }
 0x181   :  { %1648 = vmatmul.mubr.msk.f32.gmra.mxu1 %vm597_vm0, %v2230_v10 }
 0x182   :  { %v532_v12 = vpop.f32.mrf.mxu0  ;;  %1028 = vmatprep.mubr.f32.mxu1 %v2007_v24  ;;  %p1984_p5 = pnand %p1983_p4, %p1977_p1 }
 0x183   :  { %v588_v12 = vsub.s32 1, %v2280_v53 }
 0x184   :  { %v2235_v14 = vpop.f32.mrf.mxu0 }
 0x185   :  { %1649 = vmatmul.mubr.msk.f32.gmra.mxu1 %vm597_vm0, %v2235_v14 }
 0x186   :  { %v535_v16 = vpop.f32.mrf.mxu0  ;;  %1034 = vmatprep.mubr.f32.mxu1 %v2007_v24 }
 0x188   :  { %v2240_v18 = vpop.f32.mrf.mxu0 }
 0x189   :  { %1650 = vmatmul.mubr.msk.f32.gmra.mxu1 %vm597_vm0, %v2240_v18 }
 0x18a   :  { %v540_v20 = vpop.f32.mrf.mxu0  ;;  %1040 = vmatprep.mubr.f32.mxu1 %v2007_v24 }
 0x18b   :  { %v2304_v20 = vrot.slane %v2291_v4, %v588_v12 }
 0x18c   :  { %v2245_v22 = vpop.f32.mrf.mxu0 }
 0x18d   :  { %1651 = vmatmul.mubr.msk.f32.gmra.mxu1 %vm597_vm0, %v2245_v22 }
 0x18e   :  { %v543_v25 = vpop.f32.mrf.mxu0  ;;  %1046 = vmatprep.mubr.f32.mxu1 %v2007_v24 }
 0x190   :  { %v2250_v27 = vpop.f32.mrf.mxu0 }
 0x191   :  { %1652 = vmatmul.mubr.msk.f32.gmra.mxu1 %vm597_vm0, %v2250_v27 }
 0x192   :  { %v548_v29 = vpop.f32.mrf.mxu0  ;;  %1052 = vmatprep.mubr.f32.mxu1 %v2007_v24 }
 0x194   :  { %v2255_v31 = vpop.f32.mrf.mxu0 }
 0x195   :  { %1653 = vmatmul.mubr.msk.f32.gmra.mxu1 %vm597_vm0, %v2255_v31 }
 0x196   :  { %v551_v33 = vpop.f32.mrf.mxu0  ;;  %1058 = vmatprep.mubr.f32.mxu1 %v2007_v24 }
 0x198   :  { %v2260_v35 = vpop.f32.mrf.mxu0 }
 0x199   :  { %1654 = vmatmul.mubr.msk.f32.gmra.mxu1 %vm597_vm0, %v2260_v35 }
 0x19a   :  { %v556_v37 = vpop.f32.mrf.mxu0  ;;  %1064 = vmatprep.mubr.f32.mxu1 %v2007_v24 }
 0x19c   :  { %v2265_v39 = vpop.f32.mrf.mxu0 }
 0x19d   :  { %1655 = vmatmul.mubr.msk.f32.gmra.mxu1 %vm597_vm0, %v2265_v39 }
 0x19e   :  { %v559_v41 = vpop.f32.mrf.mxu0  ;;  %1070 = vmatprep.mubr.f32.mxu1 %v2007_v24 }
 0x1a0   :  { %v2270_v43 = vpop.f32.mrf.mxu0 }
 0x1a1   :  { %1656 = vmatmul.mubr.msk.f32.gmra.mxu1 %vm597_vm0, %v2270_v43 }
 0x1a2   :  { %v564_v45 = vpop.f32.mrf.mxu0  ;;  %1076 = vmatprep.mubr.f32.mxu1 %v2007_v24 }
 0x1a4   :  { %v2275_v49 = vpop.f32.mrf.mxu0 }
 0x1a5   :  { %1657 = vmatmul.mubr.msk.f32.gmra.mxu1 %vm597_vm0, %v2275_v49 }
 0x1a6   :  { %v567_v51 = vpop.f32.mrf.mxu0  ;;  %1082 = vmatprep.mubr.f32.mxu1 %v2007_v24 }
 0x1a8   :  { %v2282_v56 = vpop.f32.mrf.mxu0 }
 0x1a9   :  { %1658 = vmatmul.mubr.msk.f32.gmra.mxu1 %vm597_vm0, %v2282_v56 }
 0x1aa   :  { %v572_v60 = vpop.f32.mrf.mxu0  ;;  %1088 = vmatprep.mubr.f32.mxu1 %v2007_v24  ;;  %v2301_v24 = vrot.slane %v2291_v4, %v584_v0 }
 0x1ac   :  { %v2293_v8 = vpop.f32.mrf.mxu0 }
 0x1ad   :  { %1659 = vmatmul.mubr.msk.f32.gmra.mxu1 %vm597_vm0, %v2293_v8 }
 0x1ae   :  { %v575_v16 = vpop.f32.mrf.mxu0  ;;  %1759 = vmatprep.mubr.msk.f32.mxu1 %vm597_vm0, %v2050_v55 }
 0x1b1   :  { %v808_v25 = vpop.f32.mrf.mxu0  ;;  %1760 = vmatmul.mubr.msk.f32.vlgmr.msra.gmra.mxu1 %vm597_vm0, %v2055_v57 }
 0x1b2   :  { %v809_v29 = vadd.f32 %v808_v25, %v2301_v24  ;;  %1762 = vmatprep.mubr.msk.f32.mxu1 %vm597_vm0, %v2060_v59 }
 0x1b3   :  { %v810_v33 = vpop.f32.mrf.mxu0 }
 0x1b4   :  { %1400 = vst [vmem:[#allocation8] sm:$0xff] %v809_v29  ;;  %v811_v37 = vadd.f32 %v810_v33, %v2304_v20 }
 0x1b5   :  { %v814_v55 = vpop.f32.mrf.mxu0  ;;  %1763 = vmatmul.mubr.msk.f32.gmra.mxu1 %vm597_vm0, %v2065_v61 }
 0x1b6   :  { %1401 = vst [vmem:[#allocation8 + $0x8] sm:$0xff] %v811_v37  ;;  %v815_v41 = vadd.f32 %v814_v55, %v2301_v24  ;;  %1765 = vmatprep.mubr.msk.f32.mxu1 %vm597_vm0, %v2070_v63 }
 0x1b7   :  { %v816_v57 = vpop.f32.mrf.mxu0 }
 0x1b8   :  { %1403 = vst [vmem:[#allocation8 + $0x18] sm:$0xff] %v815_v41  ;;  %v817_v45 = vadd.f32 %v816_v57, %v2304_v20 }
 0x1b9   :  { %v820_v47 = vpop.f32.mrf.mxu0  ;;  %1766 = vmatmul.mubr.msk.f32.gmra.mxu1 %vm597_vm0, %v2075_v1 }
 0x1ba   :  { %1404 = vst [vmem:[#allocation8 + $0x20] sm:$0xff] %v817_v45  ;;  %v821_v59 = vadd.f32 %v820_v47, %v2301_v24  ;;  %1768 = vmatprep.mubr.msk.f32.mxu1 %vm597_vm0, %v2080_v3 }
 0x1bb   :  { %v822_v61 = vpop.f32.mrf.mxu0 }
 0x1bc   :  { %1406 = vst [vmem:[#allocation8 + $0x30] sm:$0xff] %v821_v59  ;;  %v823_v51 = vadd.f32 %v822_v61, %v2304_v20 }
 0x1bd   :  { %v826_v60 = vpop.f32.mrf.mxu0  ;;  %1769 = vmatmul.mubr.msk.f32.gmra.mxu1 %vm597_vm0, %v2085_v5 }
 0x1be   :  { %1407 = vst [vmem:[#allocation8 + $0x38] sm:$0xff] %v823_v51  ;;  %v827_v63 = vadd.f32 %v826_v60, %v2301_v24  ;;  %1771 = vmatprep.mubr.msk.f32.mxu1 %vm597_vm0, %v2090_v7 }
 0x1bf   :  { %v828_v1 = vpop.f32.mrf.mxu0 }
 0x1c0   :  { %1409 = vst [vmem:[#allocation8 + $0x48] sm:$0xff] %v827_v63  ;;  %v829_v0 = vadd.f32 %v828_v1, %v2304_v20 }
 0x1c1   :  { %v832_v12 = vpop.f32.mrf.mxu0  ;;  %1772 = vmatmul.mubr.msk.f32.gmra.mxu1 %vm597_vm0, %v2095_v9 }
 0x1c2   :  { %1410 = vst [vmem:[#allocation8 + $0x50] sm:$0xff] %v829_v0  ;;  %v833_v3 = vadd.f32 %v832_v12, %v2301_v24  ;;  %1774 = vmatprep.mubr.msk.f32.mxu1 %vm597_vm0, %v2100_v11 }
 0x1c3   :  { %v834_v5 = vpop.f32.mrf.mxu0 }
 0x1c4   :  { %1412 = vst [vmem:[#allocation8 + $0x60] sm:$0xff] %v833_v3  ;;  %v835_v16 = vadd.f32 %v834_v5, %v2304_v20 }
 0x1c5   :  { %v838_v25 = vpop.f32.mrf.mxu0  ;;  %1775 = vmatmul.mubr.msk.f32.gmra.mxu1 %vm597_vm0, %v2104_v13 }
 0x1c6   :  { %1413 = vst [vmem:[#allocation8 + $0x68] sm:$0xff] %v835_v16  ;;  %v839_v7 = vadd.f32 %v838_v25, %v2301_v24  ;;  %1777 = vmatprep.mubr.msk.f32.mxu1 %vm597_vm0, %v2110_v15 }
 0x1c7   :  { %v840_v9 = vpop.f32.mrf.mxu0 }
 0x1c8   :  { %1415 = vst [vmem:[#allocation8 + $0x78] sm:$0xff] %v839_v7  ;;  %v841_v29 = vadd.f32 %v840_v9, %v2304_v20 }
 0x1c9   :  { %v844_v33 = vpop.f32.mrf.mxu0  ;;  %1778 = vmatmul.mubr.msk.f32.gmra.mxu1 %vm597_vm0, %v2115_v17 }
 0x1ca   :  { %1416 = vst [vmem:[#allocation8 + $0x80] sm:$0xff] %v841_v29  ;;  %v845_v11 = vadd.f32 %v844_v33, %v2301_v24  ;;  %1780 = vmatprep.mubr.msk.f32.mxu1 %vm597_vm0, %v2120_v19 }
 0x1cb   :  { %v846_v13 = vpop.f32.mrf.mxu0 }
 0x1cc   :  { %1418 = vst [vmem:[#allocation8 + $0x90] sm:$0xff] %v845_v11  ;;  %v847_v37 = vadd.f32 %v846_v13, %v2304_v20 }
 0x1cd   :  { %v850_v55 = vpop.f32.mrf.mxu0  ;;  %1781 = vmatmul.mubr.msk.f32.gmra.mxu1 %vm597_vm0, %v2125_v21 }
 0x1ce   :  { %1419 = vst [vmem:[#allocation8 + $0x98] sm:$0xff] %v847_v37  ;;  %v851_v15 = vadd.f32 %v850_v55, %v2301_v24  ;;  %1783 = vmatprep.mubr.msk.f32.mxu1 %vm597_vm0, %v2130_v23 }
 0x1cf   :  { %v852_v17 = vpop.f32.mrf.mxu0 }
 0x1d0   :  { %1421 = vst [vmem:[#allocation8 + $0xa8] sm:$0xff] %v851_v15  ;;  %v853_v41 = vadd.f32 %v852_v17, %v2304_v20 }
 0x1d1   :  { %v856_v57 = vpop.f32.mrf.mxu0  ;;  %1784 = vmatmul.mubr.msk.f32.gmra.mxu1 %vm597_vm0, %v2135_v26 }
 0x1d2   :  { %1422 = vst [vmem:[#allocation8 + $0xb0] sm:$0xff] %v853_v41  ;;  %v857_v19 = vadd.f32 %v856_v57, %v2301_v24  ;;  %1786 = vmatprep.mubr.msk.f32.mxu1 %vm597_vm0, %v2140_v28 }
 0x1d3   :  { %v858_v21 = vpop.f32.mrf.mxu0 }
 0x1d4   :  { %1424 = vst [vmem:[#allocation8 + $0xc0] sm:$0xff] %v857_v19  ;;  %v859_v45 = vadd.f32 %v858_v21, %v2304_v20 }
 0x1d5   :  { %v862_v47 = vpop.f32.mrf.mxu0  ;;  %1787 = vmatmul.mubr.msk.f32.gmra.mxu1 %vm597_vm0, %v2145_v30 }
 0x1d6   :  { %1425 = vst [vmem:[#allocation8 + $0xc8] sm:$0xff] %v859_v45  ;;  %v863_v23 = vadd.f32 %v862_v47, %v2301_v24  ;;  %1789 = vmatprep.mubr.msk.f32.mxu1 %vm597_vm0, %v2150_v32 }
 0x1d7   :  { %v864_v26 = vpop.f32.mrf.mxu0 }
 0x1d8   :  { %1427 = vst [vmem:[#allocation8 + $0xd8] sm:$0xff] %v863_v23  ;;  %v865_v59 = vadd.f32 %v864_v26, %v2304_v20 }
 0x1d9   :  { %v868_v61 = vpop.f32.mrf.mxu0  ;;  %1790 = vmatmul.mubr.msk.f32.gmra.mxu1 %vm597_vm0, %v2155_v34 }
 0x1da   :  { %1428 = vst [vmem:[#allocation8 + $0xe0] sm:$0xff] %v865_v59  ;;  %v869_v28 = vadd.f32 %v868_v61, %v2301_v24  ;;  %1792 = vmatprep.mubr.msk.f32.mxu1 %vm597_vm0, %v2160_v36 }
 0x1db   :  { %v870_v30 = vpop.f32.mrf.mxu0 }
 0x1dc   :  { %1430 = vst [vmem:[#allocation8 + $0xf0] sm:$0xff] %v869_v28  ;;  %v871_v51 = vadd.f32 %v870_v30, %v2304_v20 }
 0x1dd   :  { %v874_v60 = vpop.f32.mrf.mxu1  ;;  %1793 = vmatmul.mubr.msk.f32.gmra.mxu1 %vm597_vm0, %v2165_v38 }
 0x1de   :  { %1431 = vst [vmem:[#allocation8 + $0xf8] sm:$0xff] %v871_v51  ;;  %v875_v32 = vadd.f32 %v874_v60, %v2301_v24  ;;  %1795 = vmatprep.mubr.msk.f32.mxu1 %vm597_vm0, %v2170_v40 }
 0x1df   :  { %v876_v34 = vpop.f32.mrf.mxu1 }
 0x1e0   :  { %1433 = vst [vmem:[#allocation8 + $0x108] sm:$0xff] %v875_v32  ;;  %v877_v63 = vadd.f32 %v876_v34, %v2304_v20 }
 0x1e1   :  { %v880_v1 = vpop.f32.mrf.mxu1  ;;  %1796 = vmatmul.mubr.msk.f32.gmra.mxu1 %vm597_vm0, %v2175_v42 }
 0x1e2   :  { %1434 = vst [vmem:[#allocation8 + $0x110] sm:$0xff] %v877_v63  ;;  %v881_v36 = vadd.f32 %v880_v1, %v2301_v24  ;;  %1798 = vmatprep.mubr.msk.f32.mxu1 %vm597_vm0, %v2180_v44 }
 0x1e3   :  { %v882_v38 = vpop.f32.mrf.mxu1 }
 0x1e4   :  { %1436 = vst [vmem:[#allocation8 + $0x120] sm:$0xff] %v881_v36  ;;  %v883_v0 = vadd.f32 %v882_v38, %v2304_v20 }
 0x1e5   :  { %v886_v12 = vpop.f32.mrf.mxu1  ;;  %1799 = vmatmul.mubr.msk.f32.gmra.mxu1 %vm597_vm0, %v2185_v46 }
 0x1e6   :  { %1437 = vst [vmem:[#allocation8 + $0x128] sm:$0xff] %v883_v0  ;;  %v887_v40 = vadd.f32 %v886_v12, %v2301_v24  ;;  %1801 = vmatprep.mubr.msk.f32.mxu1 %vm597_vm0, %v2190_v48 }
 0x1e7   :  { %v888_v42 = vpop.f32.mrf.mxu1 }
 0x1e8   :  { %1439 = vst [vmem:[#allocation8 + $0x138] sm:$0xff] %v887_v40  ;;  %v889_v3 = vadd.f32 %v888_v42, %v2304_v20 }
 0x1e9   :  { %v892_v5 = vpop.f32.mrf.mxu1  ;;  %1802 = vmatmul.mubr.msk.f32.gmra.mxu1 %vm597_vm0, %v2195_v50 }
 0x1ea   :  { %1440 = vst [vmem:[#allocation8 + $0x140] sm:$0xff] %v889_v3  ;;  %v893_v44 = vadd.f32 %v892_v5, %v2301_v24  ;;  %1804 = vmatprep.mubr.msk.f32.mxu1 %vm597_vm0, %v2200_v52 }
 0x1eb   :  { %v894_v46 = vpop.f32.mrf.mxu1 }
 0x1ec   :  { %1442 = vst [vmem:[#allocation8 + $0x150] sm:$0xff] %v893_v44  ;;  %v895_v16 = vadd.f32 %v894_v46, %v2304_v20 }
 0x1ed   :  { %v898_v25 = vpop.f32.mrf.mxu1  ;;  %1805 = vmatmul.mubr.msk.f32.gmra.mxu1 %vm597_vm0, %v2205_v54 }
 0x1ee   :  { %1443 = vst [vmem:[#allocation8 + $0x158] sm:$0xff] %v895_v16  ;;  %v899_v48 = vadd.f32 %v898_v25, %v2301_v24  ;;  %1807 = vmatprep.mubr.msk.f32.mxu1 %vm597_vm0, %v2210_v58 }
 0x1ef   :  { %v900_v50 = vpop.f32.mrf.mxu1 }
 0x1f0   :  { %1445 = vst [vmem:[#allocation8 + $0x168] sm:$0xff] %v899_v48  ;;  %v901_v7 = vadd.f32 %v900_v50, %v2304_v20 }
 0x1f1   :  { %v904_v9 = vpop.f32.mrf.mxu1  ;;  %1808 = vmatmul.mubr.msk.f32.gmra.mxu1 %vm597_vm0, %v2215_v62 }
 0x1f2   :  { %1446 = vst [vmem:[#allocation8 + $0x170] sm:$0xff] %v901_v7  ;;  %v905_v52 = vadd.f32 %v904_v9, %v2301_v24  ;;  %1810 = vmatprep.mubr.msk.f32.mxu1 %vm597_vm0, %v2220_v2 }
 0x1f3   :  { %v906_v54 = vpop.f32.mrf.mxu1 }
 0x1f4   :  { %1448 = vst [vmem:[#allocation8 + $0x180] sm:$0xff] %v905_v52  ;;  %v907_v29 = vadd.f32 %v906_v54, %v2304_v20 }
 0x1f5   :  { %v910_v33 = vpop.f32.mrf.mxu1  ;;  %1811 = vmatmul.mubr.msk.f32.gmra.mxu1 %vm597_vm0, %v2225_v6 }
 0x1f6   :  { %1449 = vst [vmem:[#allocation8 + $0x188] sm:$0xff] %v907_v29  ;;  %v911_v58 = vadd.f32 %v910_v33, %v2301_v24  ;;  %1813 = vmatprep.mubr.msk.f32.mxu1 %vm597_vm0, %v2230_v10 }
 0x1f7   :  { %v912_v62 = vpop.f32.mrf.mxu1 }
 0x1f8   :  { %1451 = vst [vmem:[#allocation8 + $0x198] sm:$0xff] %v911_v58  ;;  %v913_v11 = vadd.f32 %v912_v62, %v2304_v20 }
 0x1f9   :  { %v916_v13 = vpop.f32.mrf.mxu1  ;;  %1814 = vmatmul.mubr.msk.f32.gmra.mxu1 %vm597_vm0, %v2235_v14 }
 0x1fa   :  { %1452 = vst [vmem:[#allocation8 + $0x1a0] sm:$0xff] %v913_v11  ;;  %v917_v2 = vadd.f32 %v916_v13, %v2301_v24  ;;  %1816 = vmatprep.mubr.msk.f32.mxu1 %vm597_vm0, %v2240_v18 }
 0x1fb   :  { %v918_v6 = vpop.f32.mrf.mxu1 }
 0x1fc   :  { %1454 = vst [vmem:[#allocation8 + $0x1b0] sm:$0xff] %v917_v2  ;;  %v919_v37 = vadd.f32 %v918_v6, %v2304_v20 }
 0x1fd   :  { %v922_v55 = vpop.f32.mrf.mxu1  ;;  %1817 = vmatmul.mubr.msk.f32.gmra.mxu1 %vm597_vm0, %v2245_v22 }
 0x1fe   :  { %1455 = vst [vmem:[#allocation8 + $0x1b8] sm:$0xff] %v919_v37  ;;  %v923_v10 = vadd.f32 %v922_v55, %v2301_v24  ;;  %1819 = vmatprep.mubr.msk.f32.mxu1 %vm597_vm0, %v2250_v27 }
 0x1ff   :  { %v924_v14 = vpop.f32.mrf.mxu1 }
 0x200   :  { %1457 = vst [vmem:[#allocation8 + $0x1c8] sm:$0xff] %v923_v10  ;;  %v925_v15 = vadd.f32 %v924_v14, %v2304_v20 }
 0x201   :  { %v928_v17 = vpop.f32.mrf.mxu1  ;;  %1820 = vmatmul.mubr.msk.f32.gmra.mxu1 %vm597_vm0, %v2255_v31 }
 0x202   :  { %1458 = vst [vmem:[#allocation8 + $0x1d0] sm:$0xff] %v925_v15  ;;  %v929_v18 = vadd.f32 %v928_v17, %v2301_v24  ;;  %1822 = vmatprep.mubr.msk.f32.mxu1 %vm597_vm0, %v2260_v35 }
 0x203   :  { %v930_v22 = vpop.f32.mrf.mxu1 }
 0x204   :  { %1460 = vst [vmem:[#allocation8 + $0x1e0] sm:$0xff] %v929_v18  ;;  %v931_v41 = vadd.f32 %v930_v22, %v2304_v20 }
 0x205   :  { %v934_v57 = vpop.f32.mrf.mxu1  ;;  %1823 = vmatmul.mubr.msk.f32.gmra.mxu1 %vm597_vm0, %v2265_v39 }
 0x206   :  { %1461 = vst [vmem:[#allocation8 + $0x1e8] sm:$0xff] %v931_v41  ;;  %v935_v27 = vadd.f32 %v934_v57, %v2301_v24  ;;  %1825 = vmatprep.mubr.msk.f32.mxu1 %vm597_vm0, %v2270_v43 }
 0x207   :  { %v936_v31 = vpop.f32.mrf.mxu1 }
 0x208   :  { %1463 = vst [vmem:[#allocation8 + $0x1f8] sm:$0xff] %v935_v27  ;;  %v937_v19 = vadd.f32 %v936_v31, %v2304_v20 }
 0x209   :  { %v940_v21 = vpop.f32.mrf.mxu1  ;;  %1826 = vmatmul.mubr.msk.f32.gmra.mxu1 %vm597_vm0, %v2275_v49 }
 0x20a   :  { %1464 = vst [vmem:[#allocation8 + $0x200] sm:$0xff] %v937_v19  ;;  %v941_v35 = vadd.f32 %v940_v21, %v2301_v24  ;;  %1828 = vmatprep.mubr.msk.f32.mxu1 %vm597_vm0, %v2282_v56 }
 0x20b   :  { %v942_v39 = vpop.f32.mrf.mxu1 }
 0x20c   :  { %1466 = vst [vmem:[#allocation8 + $0x210] sm:$0xff] %v941_v35  ;;  %v943_v45 = vadd.f32 %v942_v39, %v2304_v20 }
 0x20d   :  { %v946_v47 = vpop.f32.mrf.mxu1  ;;  %1829 = vmatmul.mubr.msk.f32.gmra.mxu1 %vm597_vm0, %v2293_v8 }
 0x20e   :  { %1467 = vst [vmem:[#allocation8 + $0x218] sm:$0xff] %v943_v45  ;;  %v947_v43 = vadd.f32 %v946_v47, %v2301_v24 }
 0x20f   :  { %v948_v23 = vpop.f32.mrf.mxu1 }
 0x210   :  { %1469 = vst [vmem:[#allocation8 + $0x228] sm:$0xff] %v947_v43  ;;  %v949_v49 = vadd.f32 %v948_v23, %v2304_v20 }
 0x211   :  { %v952_v26 = vpop.f32.mrf.mxu1 }
 0x212   :  { %1470 = vst [vmem:[#allocation8 + $0x230] sm:$0xff] %v949_v49  ;;  %v953_v59 = vadd.f32 %v952_v26, %v2301_v24 }
 0x213   :  { %v954_v56 = vpop.f32.mrf.mxu1 }
 0x214   :  { %1472 = vst [vmem:[#allocation8 + $0x240] sm:$0xff] %v953_v59  ;;  %v955_v61 = vadd.f32 %v954_v56, %v2304_v20 }
 0x215   :  { %v958_v28 = vpop.f32.mrf.mxu1 }
 0x216   :  { %1473 = vst [vmem:[#allocation8 + $0x248] sm:$0xff] %v955_v61  ;;  %v959_v30 = vadd.f32 %v958_v28, %v2301_v24 }
 0x217   :  { %v960_v8 = vpop.f32.mrf.mxu1 }
 0x218   :  { %1475 = vst [vmem:[#allocation8 + $0x258] sm:$0xff] %v959_v30  ;;  %v961_v51 = vadd.f32 %v960_v8, %v2304_v20 }
 0x219   :  { %v964_v60 = vpop.f32.mrf.mxu1 }
 0x21a   :  { %1476 = vst [vmem:[#allocation8 + $0x260] sm:$0xff] %v961_v51  ;;  %v965_v32 = vadd.f32 %v964_v60, %v2301_v24 }
 0x21b   :  { %v966_v34 = vpop.f32.mrf.mxu1 }
 0x21c   :  { %1478 = vst [vmem:[#allocation8 + $0x270] sm:$0xff] %v965_v32  ;;  %v967_v63 = vadd.f32 %v966_v34, %v2304_v20 }
 0x21d   :  { %v970_v1 = vpop.f32.mrf.mxu1 }
 0x21e   :  { %1479 = vst [vmem:[#allocation8 + $0x278] sm:$0xff] %v967_v63  ;;  %v971_v36 = vadd.f32 %v970_v1, %v2301_v24 }
 0x21f   :  { %v972_v38 = vpop.f32.mrf.mxu1 }
 0x220   :  { %1481 = vst [vmem:[#allocation8 + $0x288] sm:$0xff] %v971_v36  ;;  %v973_v0 = vadd.f32 %v972_v38, %v2304_v20 }
 0x221   :  { %v976_v12 = vpop.f32.mrf.mxu1 }
 0x222   :  { %1482 = vst [vmem:[#allocation8 + $0x290] sm:$0xff] %v973_v0  ;;  %v977_v40 = vadd.f32 %v976_v12, %v2301_v24 }
 0x223   :  { %v978_v42 = vpop.f32.mrf.mxu1 }
 0x224   :  { %1484 = vst [vmem:[#allocation8 + $0x2a0] sm:$0xff] %v977_v40  ;;  %v979_v3 = vadd.f32 %v978_v42, %v2304_v20 }
 0x225   :  { %v982_v5 = vpop.f32.mrf.mxu1 }
 0x226   :  { %1485 = vst [vmem:[#allocation8 + $0x2a8] sm:$0xff] %v979_v3  ;;  %v983_v44 = vadd.f32 %v982_v5, %v2301_v24 }
 0x227   :  { %v984_v46 = vpop.f32.mrf.mxu1 }
 0x228   :  { %1487 = vst [vmem:[#allocation8 + $0x2b8] sm:$0xff] %v983_v44  ;;  %v985_v16 = vadd.f32 %v984_v46, %v2304_v20 }
 0x229   :  { %v988_v25 = vpop.f32.mrf.mxu1 }
 0x22a   :  { %1488 = vst [vmem:[#allocation8 + $0x2c0] sm:$0xff] %v985_v16  ;;  %v989_v48 = vadd.f32 %v988_v25, %v2301_v24 }
 0x22b   :  { %v990_v50 = vpop.f32.mrf.mxu1 }
 0x22c   :  { %1490 = vst [vmem:[#allocation8 + $0x2d0] sm:$0xff] %v989_v48  ;;  %v991_v7 = vadd.f32 %v990_v50, %v2304_v20 }
 0x22d   :  { %v994_v9 = vpop.f32.mrf.mxu1 }
 0x22e   :  { %1491 = vst [vmem:[#allocation8 + $0x2d8] sm:$0xff] %v991_v7  ;;  %v995_v52 = vadd.f32 %v994_v9, %v2301_v24 }
 0x22f   :  { %v996_v54 = vpop.f32.mrf.mxu1 }
 0x230   :  { %1493 = vst [vmem:[#allocation8 + $0x2e8] sm:$0xff] %v995_v52  ;;  %v997_v29 = vadd.f32 %v996_v54, %v2304_v20  ;;  %v592_v54 = vsub.s32 2, %v2280_v53 }
 0x231   :  { %v1000_v33 = vpop.f32.mrf.mxu1 }
 0x232   :  { %1494 = vst [vmem:[#allocation8 + $0x2f0] sm:$0xff] %v997_v29  ;;  %v1001_v58 = vadd.f32 %v1000_v33, %v2301_v24 }
 0x233   :  { %v1002_v62 = vpop.f32.mrf.mxu1 }
 0x234   :  { %1496 = vst [vmem:[#allocation8 + $0x300] sm:$0xff] %v1001_v58  ;;  %v1003_v11 = vadd.f32 %v1002_v62, %v2304_v20 }
 0x235   :  { %v1006_v13 = vpop.f32.mrf.mxu1 }
 0x236   :  { %1497 = vst [vmem:[#allocation8 + $0x308] sm:$0xff] %v1003_v11  ;;  %v1007_v2 = vadd.f32 %v1006_v13, %v2301_v24  ;;  %v2497_v11 = vrot.slane %v2291_v4, %v592_v54 }
 0x237   :  { %v1008_v6 = vpop.f32.mrf.mxu1 }
 0x238   :  { %1499 = vst [vmem:[#allocation8 + $0x318] sm:$0xff] %v1007_v2  ;;  %v1009_v37 = vadd.f32 %v1008_v6, %v2304_v20 }
 0x239   :  { %v1012_v55 = vpop.f32.mrf.mxu1 }
 0x23a   :  { %1500 = vst [vmem:[#allocation8 + $0x320] sm:$0xff] %v1009_v37  ;;  %v1013_v10 = vadd.f32 %v1012_v55, %v2301_v24 }
 0x23b   :  { %v1014_v14 = vpop.f32.mrf.mxu1 }
 0x23c   :  { %1502 = vst [vmem:[#allocation8 + $0x330] sm:$0xff] %v1013_v10  ;;  %v1015_v15 = vadd.f32 %v1014_v14, %v2304_v20 }
 0x23d   :  { %v1018_v17 = vpop.f32.mrf.mxu1 }
 0x23e   :  { %1503 = vst [vmem:[#allocation8 + $0x338] sm:$0xff] %v1015_v15  ;;  %v1019_v18 = vadd.f32 %v1018_v17, %v2301_v24 }
 0x23f   :  { %v1020_v22 = vpop.f32.mrf.mxu1 }
 0x240   :  { %1505 = vst [vmem:[#allocation8 + $0x348] sm:$0xff] %v1019_v18  ;;  %v1021_v41 = vadd.f32 %v1020_v22, %v2304_v20 }
 0x241   :  { %v1024_v57 = vpop.f32.mrf.mxu1 }
 0x242   :  { %1506 = vst [vmem:[#allocation8 + $0x350] sm:$0xff] %v1021_v41  ;;  %v1025_v27 = vadd.f32 %v1024_v57, %v2301_v24 }
 0x243   :  { %v1026_v31 = vpop.f32.mrf.mxu1 }
 0x244   :  { %1508 = vst [vmem:[#allocation8 + $0x360] sm:$0xff] %v1025_v27  ;;  %v1027_v19 = vadd.f32 %v1026_v31, %v2304_v20 }
 0x245   :  { %v1030_v21 = vpop.f32.mrf.mxu1 }
 0x246   :  { %1509 = vst [vmem:[#allocation8 + $0x368] sm:$0xff] %v1027_v19  ;;  %v1031_v35 = vadd.f32 %v1030_v21, %v2301_v24 }
 0x247   :  { %v1032_v39 = vpop.f32.mrf.mxu1 }
 0x248   :  { %1511 = vst [vmem:[#allocation8 + $0x378] sm:$0xff] %v1031_v35  ;;  %v1033_v45 = vadd.f32 %v1032_v39, %v2304_v20 }
 0x249   :  { %v1036_v47 = vpop.f32.mrf.mxu1 }
 0x24a   :  { %1512 = vst [vmem:[#allocation8 + $0x380] sm:$0xff] %v1033_v45  ;;  %v1037_v43 = vadd.f32 %v1036_v47, %v2301_v24 }
 0x24b   :  { %v1038_v23 = vpop.f32.mrf.mxu1 }
 0x24c   :  { %1514 = vst [vmem:[#allocation8 + $0x390] sm:$0xff] %v1037_v43  ;;  %v1039_v49 = vadd.f32 %v1038_v23, %v2304_v20 }
 0x24d   :  { %v1042_v26 = vpop.f32.mrf.mxu1 }
 0x24e   :  { %1515 = vst [vmem:[#allocation8 + $0x398] sm:$0xff] %v1039_v49  ;;  %v1043_v59 = vadd.f32 %v1042_v26, %v2301_v24 }
 0x24f   :  { %v1044_v56 = vpop.f32.mrf.mxu1 }
 0x250   :  { %1517 = vst [vmem:[#allocation8 + $0x3a8] sm:$0xff] %v1043_v59  ;;  %v1045_v61 = vadd.f32 %v1044_v56, %v2304_v20 }
 0x251   :  { %v1048_v28 = vpop.f32.mrf.mxu1 }
 0x252   :  { %1518 = vst [vmem:[#allocation8 + $0x3b0] sm:$0xff] %v1045_v61  ;;  %v1049_v30 = vadd.f32 %v1048_v28, %v2301_v24 }
 0x253   :  { %v1050_v8 = vpop.f32.mrf.mxu1 }
 0x254   :  { %1520 = vst [vmem:[#allocation8 + $0x3c0] sm:$0xff] %v1049_v30  ;;  %v1051_v51 = vadd.f32 %v1050_v8, %v2304_v20 }
 0x255   :  { %v1054_v60 = vpop.f32.mrf.mxu1 }
 0x256   :  { %1521 = vst [vmem:[#allocation8 + $0x3c8] sm:$0xff] %v1051_v51  ;;  %v1055_v32 = vadd.f32 %v1054_v60, %v2301_v24 }
 0x257   :  { %v1056_v34 = vpop.f32.mrf.mxu1 }
 0x258   :  { %1523 = vst [vmem:[#allocation8 + $0x3d8] sm:$0xff] %v1055_v32  ;;  %v1057_v63 = vadd.f32 %v1056_v34, %v2304_v20 }
 0x259   :  { %v1060_v1 = vpop.f32.mrf.mxu1 }
 0x25a   :  { %1524 = vst [vmem:[#allocation8 + $0x3e0] sm:$0xff] %v1057_v63  ;;  %v1061_v36 = vadd.f32 %v1060_v1, %v2301_v24 }
 0x25b   :  { %v1062_v38 = vpop.f32.mrf.mxu1 }
 0x25c   :  { %1526 = vst [vmem:[#allocation8 + $0x3f0] sm:$0xff] %v1061_v36  ;;  %v1063_v0 = vadd.f32 %v1062_v38, %v2304_v20 }
 0x25d   :  { %v1066_v12 = vpop.f32.mrf.mxu1 }
 0x25e   :  { %1527 = vst [vmem:[#allocation8 + $0x3f8] sm:$0xff] %v1063_v0  ;;  %v1067_v40 = vadd.f32 %v1066_v12, %v2301_v24 }
 0x25f   :  { %v1068_v42 = vpop.f32.mrf.mxu1 }
 0x260   :  { %1529 = vst [vmem:[#allocation8 + $0x408] sm:$0xff] %v1067_v40  ;;  %v1069_v3 = vadd.f32 %v1068_v42, %v2304_v20 }
 0x261   :  { %v1072_v5 = vpop.f32.mrf.mxu1 }
 0x262   :  { %1530 = vst [vmem:[#allocation8 + $0x410] sm:$0xff] %v1069_v3  ;;  %v1073_v44 = vadd.f32 %v1072_v5, %v2301_v24 }
 0x263   :  { %v1074_v46 = vpop.f32.mrf.mxu1 }
 0x264   :  { %1532 = vst [vmem:[#allocation8 + $0x420] sm:$0xff] %v1073_v44  ;;  %v1075_v16 = vadd.f32 %v1074_v46, %v2304_v20 }
 0x265   :  { %v1078_v25 = vpop.f32.mrf.mxu1 }
 0x266   :  { %1533 = vst [vmem:[#allocation8 + $0x428] sm:$0xff] %v1075_v16  ;;  %v1079_v48 = vadd.f32 %v1078_v25, %v2301_v24 }
 0x267   :  { %v1080_v50 = vpop.f32.mrf.mxu1 }
 0x268   :  { %1535 = vst [vmem:[#allocation8 + $0x438] sm:$0xff] %v1079_v48  ;;  %v1081_v7 = vadd.f32 %v1080_v50, %v2304_v20 }
 0x269   :  { %v1084_v9 = vpop.f32.mrf.mxu1 }
 0x26a   :  { %1536 = vst [vmem:[#allocation8 + $0x440] sm:$0xff] %v1081_v7  ;;  %v1085_v52 = vadd.f32 %v1084_v9, %v2301_v24 }
 0x26b   :  { %v1086_v29 = vpop.f32.mrf.mxu1 }
 0x26c   :  { %1538 = vst [vmem:[#allocation8 + $0x450] sm:$0xff] %v1085_v52  ;;  %v1087_v33 = vadd.f32 %v1086_v29, %v2304_v20 }
 0x26d   :  { %v1090_v58 = vpop.f32.mrf.mxu1 }
 0x26e   :  { %1539 = vst [vmem:[#allocation8 + $0x458] sm:$0xff] %v1087_v33  ;;  %v1091_v62 = vadd.f32 %v1090_v58, %v2301_v24 }
 0x26f   :  { %v1092_v13 = vpop.f32.mrf.mxu1 }
 0x270   :  { %1541 = vst [vmem:[#allocation8 + $0x468] sm:$0xff] %v1091_v62  ;;  %v1093_v2 = vadd.f32 %v1092_v13, %v2304_v20 }
 0x271   :  { %v1761_v6 = vpop.f32.mrf.mxu1 }
 0x272   :  { %1542 = vst [vmem:[#allocation8 + $0x470] sm:$0xff] %v1093_v2  ;;  %v1167_v37 = vadd.f32 %v1761_v6, %v2497_v11 }
 0x273   :  { %v1161_v53 = vpop.f32.mrf.mxu1 }
 0x274   :  { %1405 = vst [vmem:[#allocation8 + $0x28] sm:$0xff] %v1167_v37  ;;  %v1162_v55 = vadd.f32 %v1161_v53, %v2497_v11 }
 0x275   :  { %v1764_v10 = vpop.f32.mrf.mxu1 }
 0x276   :  { %1402 = vst [vmem:[#allocation8 + $0x10] sm:$0xff] %v1162_v55  ;;  %v1177_v14 = vadd.f32 %v1764_v10, %v2497_v11 }
 0x277   :  { %v1171_v24 = vpop.f32.mrf.mxu1 }
 0x278   :  { %1411 = vst [vmem:[#allocation8 + $0x58] sm:$0xff] %v1177_v14  ;;  %v1172_v4 = vadd.f32 %v1171_v24, %v2497_v11 }
 0x279   :  { %v1767_v15 = vpop.f32.mrf.mxu1 }
 0x27a   :  { %1408 = vst [vmem:[#allocation8 + $0x40] sm:$0xff] %v1172_v4  ;;  %v1187_v20 = vadd.f32 %v1767_v15, %v2497_v11 }
 0x27b   :  { %v1181_v17 = vpop.f32.mrf.mxu1 }
 0x27c   :  { %1417 = vst [vmem:[#allocation8 + $0x88] sm:$0xff] %v1187_v20  ;;  %v1182_v18 = vadd.f32 %v1181_v17, %v2497_v11 }
 0x27d   :  { %v1770_v22 = vpop.f32.mrf.mxu1 }
 0x27e   :  { %1414 = vst [vmem:[#allocation8 + $0x70] sm:$0xff] %v1182_v18  ;;  %v1197_v41 = vadd.f32 %v1770_v22, %v2497_v11 }
 0x27f   :  { %v1191_v57 = vpop.f32.mrf.mxu1 }
 0x280   :  { %1423 = vst [vmem:[#allocation8 + $0xb8] sm:$0xff] %v1197_v41  ;;  %v1192_v27 = vadd.f32 %v1191_v57, %v2497_v11 }
 0x281   :  { %v1773_v31 = vpop.f32.mrf.mxu1 }
 0x282   :  { %1420 = vst [vmem:[#allocation8 + $0xa0] sm:$0xff] %v1192_v27  ;;  %v1207_v19 = vadd.f32 %v1773_v31, %v2497_v11 }
 0x283   :  { %v1201_v21 = vpop.f32.mrf.mxu1 }
 0x284   :  { %1429 = vst [vmem:[#allocation8 + $0xe8] sm:$0xff] %v1207_v19  ;;  %v1202_v35 = vadd.f32 %v1201_v21, %v2497_v11 }
 0x285   :  { %v1776_v39 = vpop.f32.mrf.mxu1 }
 0x286   :  { %1426 = vst [vmem:[#allocation8 + $0xd0] sm:$0xff] %v1202_v35  ;;  %v1217_v45 = vadd.f32 %v1776_v39, %v2497_v11 }
 0x287   :  { %v1211_v47 = vpop.f32.mrf.mxu1 }
 0x288   :  { %1435 = vst [vmem:[#allocation8 + $0x118] sm:$0xff] %v1217_v45  ;;  %v1212_v43 = vadd.f32 %v1211_v47, %v2497_v11 }
 0x289   :  { %v1779_v23 = vpop.f32.mrf.mxu1 }
 0x28a   :  { %1432 = vst [vmem:[#allocation8 + $0x100] sm:$0xff] %v1212_v43  ;;  %v1227_v49 = vadd.f32 %v1779_v23, %v2497_v11 }
 0x28b   :  { %v1221_v26 = vpop.f32.mrf.mxu1 }
 0x28c   :  { %1441 = vst [vmem:[#allocation8 + $0x148] sm:$0xff] %v1227_v49  ;;  %v1222_v59 = vadd.f32 %v1221_v26, %v2497_v11 }
 0x28d   :  { %v1782_v56 = vpop.f32.mrf.mxu1 }
 0x28e   :  { %1438 = vst [vmem:[#allocation8 + $0x130] sm:$0xff] %v1222_v59  ;;  %v1237_v61 = vadd.f32 %v1782_v56, %v2497_v11 }
 0x28f   :  { %v1231_v28 = vpop.f32.mrf.mxu1 }
 0x290   :  { %1447 = vst [vmem:[#allocation8 + $0x178] sm:$0xff] %v1237_v61  ;;  %v1232_v30 = vadd.f32 %v1231_v28, %v2497_v11 }
 0x291   :  { %v1785_v8 = vpop.f32.mrf.mxu1 }
 0x292   :  { %1444 = vst [vmem:[#allocation8 + $0x160] sm:$0xff] %v1232_v30  ;;  %v1247_v51 = vadd.f32 %v1785_v8, %v2497_v11 }
 0x293   :  { %v1241_v60 = vpop.f32.mrf.mxu1 }
 0x294   :  { %1453 = vst [vmem:[#allocation8 + $0x1a8] sm:$0xff] %v1247_v51  ;;  %v1242_v32 = vadd.f32 %v1241_v60, %v2497_v11 }
 0x295   :  { %v1788_v34 = vpop.f32.mrf.mxu1 }
 0x296   :  { %1450 = vst [vmem:[#allocation8 + $0x190] sm:$0xff] %v1242_v32  ;;  %v1257_v63 = vadd.f32 %v1788_v34, %v2497_v11 }
 0x297   :  { %v1251_v1 = vpop.f32.mrf.mxu1 }
 0x298   :  { %1459 = vst [vmem:[#allocation8 + $0x1d8] sm:$0xff] %v1257_v63  ;;  %v1252_v36 = vadd.f32 %v1251_v1, %v2497_v11 }
 0x299   :  { %v1791_v38 = vpop.f32.mrf.mxu1 }
 0x29a   :  { %1456 = vst [vmem:[#allocation8 + $0x1c0] sm:$0xff] %v1252_v36  ;;  %v1267_v0 = vadd.f32 %v1791_v38, %v2497_v11 }
 0x29b   :  { %v1261_v12 = vpop.f32.mrf.mxu1 }
 0x29c   :  { %1465 = vst [vmem:[#allocation8 + $0x208] sm:$0xff] %v1267_v0  ;;  %v1262_v40 = vadd.f32 %v1261_v12, %v2497_v11 }
 0x29d   :  { %v1794_v42 = vpop.f32.mrf.mxu1 }
 0x29e   :  { %1462 = vst [vmem:[#allocation8 + $0x1f0] sm:$0xff] %v1262_v40  ;;  %v1277_v3 = vadd.f32 %v1794_v42, %v2497_v11 }
 0x29f   :  { %v1271_v5 = vpop.f32.mrf.mxu1 }
 0x2a0   :  { %1471 = vst [vmem:[#allocation8 + $0x238] sm:$0xff] %v1277_v3  ;;  %v1272_v44 = vadd.f32 %v1271_v5, %v2497_v11 }
 0x2a1   :  { %v1797_v46 = vpop.f32.mrf.mxu1 }
 0x2a2   :  { %1468 = vst [vmem:[#allocation8 + $0x220] sm:$0xff] %v1272_v44  ;;  %v1287_v16 = vadd.f32 %v1797_v46, %v2497_v11 }
 0x2a3   :  { %v1281_v25 = vpop.f32.mrf.mxu1 }
 0x2a4   :  { %1477 = vst [vmem:[#allocation8 + $0x268] sm:$0xff] %v1287_v16  ;;  %v1282_v48 = vadd.f32 %v1281_v25, %v2497_v11 }
 0x2a5   :  { %v1800_v50 = vpop.f32.mrf.mxu1 }
 0x2a6   :  { %1474 = vst [vmem:[#allocation8 + $0x250] sm:$0xff] %v1282_v48  ;;  %v1297_v7 = vadd.f32 %v1800_v50, %v2497_v11 }
 0x2a7   :  { %v1291_v9 = vpop.f32.mrf.mxu1 }
 0x2a8   :  { %1483 = vst [vmem:[#allocation8 + $0x298] sm:$0xff] %v1297_v7  ;;  %v1292_v52 = vadd.f32 %v1291_v9, %v2497_v11 }
 0x2a9   :  { %v1803_v54 = vpop.f32.mrf.mxu1 }
 0x2aa   :  { %1480 = vst [vmem:[#allocation8 + $0x280] sm:$0xff] %v1292_v52  ;;  %v1307_v29 = vadd.f32 %v1803_v54, %v2497_v11 }
 0x2ab   :  { %v1301_v33 = vpop.f32.mrf.mxu1 }
 0x2ac   :  { %1489 = vst [vmem:[#allocation8 + $0x2c8] sm:$0xff] %v1307_v29  ;;  %v1302_v58 = vadd.f32 %v1301_v33, %v2497_v11 }
 0x2ad   :  { %v1806_v62 = vpop.f32.mrf.mxu1 }
 0x2ae   :  { %1486 = vst [vmem:[#allocation8 + $0x2b0] sm:$0xff] %v1302_v58  ;;  %v1317_v13 = vadd.f32 %v1806_v62, %v2497_v11 }
 0x2af   :  { %v1311_v2 = vpop.f32.mrf.mxu1 }
 0x2b0   :  { %1495 = vst [vmem:[#allocation8 + $0x2f8] sm:$0xff] %v1317_v13  ;;  %v1312_v6 = vadd.f32 %v1311_v2, %v2497_v11 }
 0x2b1   :  { %v1809_v37 = vpop.f32.mrf.mxu1 }
 0x2b2   :  { %1492 = vst [vmem:[#allocation8 + $0x2e0] sm:$0xff] %v1312_v6  ;;  %v1327_v53 = vadd.f32 %v1809_v37, %v2497_v11 }
 0x2b3   :  { %v1321_v55 = vpop.f32.mrf.mxu1 }
 0x2b4   :  { %1501 = vst [vmem:[#allocation8 + $0x328] sm:$0xff] %v1327_v53  ;;  %v1322_v10 = vadd.f32 %v1321_v55, %v2497_v11 }
 0x2b5   :  { %v1812_v14 = vpop.f32.mrf.mxu1 }
 0x2b6   :  { %1498 = vst [vmem:[#allocation8 + $0x310] sm:$0xff] %v1322_v10  ;;  %v1337_v24 = vadd.f32 %v1812_v14, %v2497_v11 }
 0x2b7   :  { %v1331_v4 = vpop.f32.mrf.mxu1 }
 0x2b8   :  { %1507 = vst [vmem:[#allocation8 + $0x358] sm:$0xff] %v1337_v24  ;;  %v1332_v15 = vadd.f32 %v1331_v4, %v2497_v11 }
 0x2b9   :  { %v1815_v20 = vpop.f32.mrf.mxu1 }
 0x2ba   :  { %1504 = vst [vmem:[#allocation8 + $0x340] sm:$0xff] %v1332_v15  ;;  %v1347_v17 = vadd.f32 %v1815_v20, %v2497_v11 }
 0x2bb   :  { %v1341_v18 = vpop.f32.mrf.mxu1 }
 0x2bc   :  { %1513 = vst [vmem:[#allocation8 + $0x388] sm:$0xff] %v1347_v17  ;;  %v1342_v22 = vadd.f32 %v1341_v18, %v2497_v11 }
 0x2bd   :  { %v1818_v41 = vpop.f32.mrf.mxu1 }
 0x2be   :  { %1510 = vst [vmem:[#allocation8 + $0x370] sm:$0xff] %v1342_v22  ;;  %v1357_v57 = vadd.f32 %v1818_v41, %v2497_v11 }
 0x2bf   :  { %v1351_v27 = vpop.f32.mrf.mxu1 }
 0x2c0   :  { %1519 = vst [vmem:[#allocation8 + $0x3b8] sm:$0xff] %v1357_v57  ;;  %v1352_v31 = vadd.f32 %v1351_v27, %v2497_v11 }
 0x2c1   :  { %v1821_v19 = vpop.f32.mrf.mxu1 }
 0x2c2   :  { %1516 = vst [vmem:[#allocation8 + $0x3a0] sm:$0xff] %v1352_v31  ;;  %v1367_v21 = vadd.f32 %v1821_v19, %v2497_v11 }
 0x2c3   :  { %v1361_v35 = vpop.f32.mrf.mxu1 }
 0x2c4   :  { %1525 = vst [vmem:[#allocation8 + $0x3e8] sm:$0xff] %v1367_v21  ;;  %v1362_v39 = vadd.f32 %v1361_v35, %v2497_v11 }
 0x2c5   :  { %v1824_v45 = vpop.f32.mrf.mxu1 }
 0x2c6   :  { %1522 = vst [vmem:[#allocation8 + $0x3d0] sm:$0xff] %v1362_v39  ;;  %v1377_v47 = vadd.f32 %v1824_v45, %v2497_v11 }
 0x2c7   :  { %v1371_v43 = vpop.f32.mrf.mxu1 }
 0x2c8   :  { %1531 = vst [vmem:[#allocation8 + $0x418] sm:$0xff] %v1377_v47  ;;  %v1372_v23 = vadd.f32 %v1371_v43, %v2497_v11 }
 0x2c9   :  { %v1827_v49 = vpop.f32.mrf.mxu1 }
 0x2ca   :  { %1528 = vst [vmem:[#allocation8 + $0x400] sm:$0xff] %v1372_v23  ;;  %v1387_v26 = vadd.f32 %v1827_v49, %v2497_v11 }
 0x2cb   :  { %v1381_v59 = vpop.f32.mrf.mxu1 }
 0x2cc   :  { %1537 = vst [vmem:[#allocation8 + $0x448] sm:$0xff] %v1387_v26  ;;  %v1382_v56 = vadd.f32 %v1381_v59, %v2497_v11 }
 0x2cd   :  { %v1830_v61 = vpop.f32.mrf.mxu1 }
 0x2ce   :  { %1534 = vst [vmem:[#allocation8 + $0x430] sm:$0xff] %v1382_v56  ;;  %v1397_v28 = vadd.f32 %v1830_v61, %v2497_v11 }
 0x2cf   :  { %v1391_v30 = vpop.f32.mrf.mxu1 }
 0x2d0   :  { %1543 = vst [vmem:[#allocation8 + $0x478] sm:$0xff] %v1397_v28  ;;  %v1392_v8 = vadd.f32 %v1391_v30, %v2497_v11 }
 0x2d2   :  { %1540 = vst [vmem:[#allocation8 + $0x460] sm:$0xff] %v1392_v8 }
 0x2d3   :  { %1987 = shalt.err (!%p1984_p5)
}
 0x2d4   :  { %s2009_s7 = smov 384   ;;  %s2010_s8 = smov 24  }
 0x2d5   :  { %1555 = dma.vmem_to_hbm [thread:$0]  %s1550_s5, 18432, %s2555_s4, [#allocation4], %s2009_s7, %s2009_s7, %s2010_s8  }
 0x2d6   :  { %2000 = dma.done.wait [#allocation4], 18432  }
 0x2d7   :  { %2001 = vsyncadd [#allocation4], 4294948864 }
 0x2d8   :  { %1559 = vsyncpa [#allocation3], 1 }
 0x2d9   :  { %1560 = vsyncpa [#allocation6], 1 }
 0x2da   :  { %1561 = vsyncpa [#allocation4], 1 }

</bundles_post_ra>
